<compile_context>
chip_gen: v6e
topology: v6e:2x2x1
jax: 0.10.0
libtpu: 0.0.40
codegen_flags: <defaults>
</compile_context>

<pallas_src>
import math

import jax
import jax.numpy as jnp
from jax.experimental import pallas as pl
from jax.experimental.pallas import tpu as pltpu


# ------------------------------ fused Pallas kernel --------------------------

def medvidnet_kernel(x_ref, vmask_ref, amask_ref,          # per-video blocks
                     w_ref, be_ref, qh_ref, oh_ref, wfc_ref, bfc_ref,  # weights
                     out_ref, attn_ref):                    # outputs
    Bblk, T_slot, CHW = x_ref.shape
    F = w_ref.shape[1]
    H = qh_ref.shape[0]

    # Encoder: GAP folded into w_ref -> one MXU matmul over all videos in the block
    # (M = Bblk * T_slot). bf16 inputs, f32 accumulation.
    x2 = x_ref[...].reshape(Bblk * T_slot, CHW)
    h = jnp.dot(x2, w_ref[...], preferred_element_type=jnp.float32) + be_ref[...]
    # Zero padded frames (matches torch pad_sequence zeros exactly).
    h3 = h.reshape(Bblk, T_slot, F) * vmask_ref[...]                      # (B, T, F)

    # Per-head scores directly in the lane-dense (B, H, T) layout.
    # qh is the block-diagonal per-head query with 1/sqrt(S) folded in, shaped (H, F).
    qb = jnp.broadcast_to(qh_ref[...][None], (Bblk, H, F))
    alpha = jnp.einsum('bhf,btf->bht', qb, h3,
                       preferred_element_type=jnp.float32)               # (B, H, T)
    # amask: 0 for valid frames, -50 for torch pad rows, -1e30 for slot-alignment rows.
    alpha = alpha + amask_ref[...]

    # Softmax over frames (last / lane axis).
    m = jnp.max(alpha, axis=-1, keepdims=True)
    e = jnp.exp(alpha - m)
    attn = e / jnp.sum(e, axis=-1, keepdims=True)                         # (B, H, T)
    attn_ref[...] = attn

    # Attention pooling as one batched MXU matmul, then a tiny one-hot head select.
    pooled = jnp.einsum('bht,btf->bhf', attn, h3,
                        preferred_element_type=jnp.float32)               # (B, H, F)
    h_vid = jnp.sum(pooled * oh_ref[...][None], axis=1)                   # (B, F)

    # fc_out (Dropout(p=0.0) is identity).
    out = jnp.dot(h_vid, wfc_ref[...], preferred_element_type=jnp.float32) + bfc_ref[...]
    out_ref[...] = out[:, None, :]


# ------------------------------ JAX wrapper -----------------------------------

def medvidnet_forward(x, num_frames, params):
    """MedVidNet forward (pooling='attn', drop_rate=0.0), fused in a single Pallas call.

    params = (w_enc, b_enc, attn_query_vecs, w_fc, b_fc)
    Returns (output (B, num_out), attn (T_pad, B, num_heads)) like the torch module.
    """
    w_enc, b_enc, q, w_fc, b_fc = params
    T_total, C, Hh, Ww = x.shape
    HW = Hh * Ww
    CHW = C * HW
    F = w_enc.shape[1]
    num_heads, S = q.shape
    num_out = w_fc.shape[1]
    assert F == num_heads * S, "num_features must be divisible by num_heads"
    scale = math.sqrt(S)

    num_frames = [int(n) for n in num_frames]         # static -> retrace per config
    B = len(num_frames)
    T_pad = max(num_frames)
    T_slot = max(8, ((T_pad + 7) // 8) * 8)           # 8-row (sublane) aligned slot

    # ---- per-step video block: fill the MXU M dim, bounded by a VMEM budget ----
    target_rows = 256                                  # v6e/v7x MXU; >=128 covers v5e
    Bblk = max(1, min(B, max(1, target_rows // T_slot)))
    x_block_bytes = T_slot * CHW * 2                   # bf16
    x_block_budget = 8 * 1024 * 1024                   # per-buffer cap (v7x 64 MiB safe)
    Bblk = max(1, min(Bblk, max(1, x_block_budget // max(1, x_block_bytes))))
    B_pad = ((B + Bblk - 1) // Bblk) * Bblk
    n_steps = B_pad // Bblk

    # ---- pack frames into (B_pad, T_slot, CHW) bf16 with ONE vectorized gather ----
    x_flat = x.reshape(T_total, CHW).astype(jnp.float32)
    x_flat_z = jnp.concatenate([x_flat, jnp.zeros((1, CHW), jnp.float32)], axis=0)
    offs, acc = [], 0
    for n in num_frames:
        offs.append(acc)
        acc += n
    off = jnp.asarray(offs + [0] * (B_pad - B), jnp.int32)          # (B_pad,)
    nf = jnp.asarray(num_frames + [0] * (B_pad - B), jnp.int32)     # (B_pad,)
    t_idx = jnp.arange(T_slot, dtype=jnp.int32)
    valid = t_idx[None, :] < nf[:, None]                            # (B_pad, T_slot)
    gidx = jnp.where(valid, off[:, None] + t_idx[None, :], T_total)
    x_packed = jnp.take(x_flat_z, gidx, axis=0).astype(jnp.bfloat16)  # (B_pad,T_slot,CHW)

    # ---- host-precomputed masks (no per-step iota/compare rebuilds) ----
    vmask = valid.astype(jnp.float32)[:, :, None]                   # (B_pad, T_slot, 1)
    amask = jnp.where(valid, 0.0,
                      jnp.where(t_idx[None, :] < T_pad, -50.0, -1e30)
                      ).astype(jnp.float32)[:, None, :]             # (B_pad, 1, T_slot)

    # ---- one-time parameter prep (plain XLA, outside the kernel) ----
    # Fold GAP into the encoder linear -> (CHW, F) bf16 weight.
    # TODO(synk): at very large CHW*F, do the HW mean on-chip instead of folding.
    w_exp = (jnp.repeat(w_enc.astype(jnp.float32), HW, axis=0)
             / jnp.float32(HW)).astype(jnp.bfloat16)                # (CHW, F)
    b_enc_f = b_enc.reshape(1, F).astype(jnp.float32)
    head_of_f = jnp.arange(F) // S
    oh = (head_of_f[None, :] == jnp.arange(num_heads)[:, None]).astype(jnp.float32)  # (H,F)
    qh = oh * (q.reshape(1, F).astype(jnp.float32) / jnp.float32(scale))             # (H,F)
    w_fc_f = w_fc.astype(jnp.float32)
    b_fc_f = b_fc.reshape(1, num_out).astype(jnp.float32)

    # ---- VMEM / cost bookkeeping ----
    f32b, bf16b = 4, 2
    block_bytes = (Bblk * T_slot * CHW * bf16b          # x block
                   + Bblk * T_slot * f32b               # vmask
                   + Bblk * T_slot * f32b               # amask
                   + Bblk * num_out * f32b              # out
                   + Bblk * num_heads * T_slot * f32b)  # attn
    weight_bytes = (CHW * F * bf16b + F * f32b + 2 * num_heads * F * f32b
                    + F * num_out * f32b + num_out * f32b)
    temp_bytes = 4 * Bblk * T_slot * F * f32b           # h/h3/alpha/e temporaries
    needed = 2 * block_bytes + 2 * weight_bytes + temp_bytes
    vmem_limit = int(min(64 * 1024 * 1024, max(32 * 1024 * 1024, 2 * needed)))

    M = Bblk * T_slot
    flops = n_steps * (2 * M * CHW * F                 # encoder matmul
                       + 2 * M * F * num_heads         # scores
                       + 2 * Bblk * num_heads * T_slot * F   # pooling matmul
                       + 2 * Bblk * F * num_out)       # fc_out
    bytes_accessed = (x_packed.size * bf16b
                      + (vmask.size + amask.size) * f32b
                      + weight_bytes
                      + (B_pad * num_out + B_pad * num_heads * T_slot) * f32b)
    transcendentals = B_pad * num_heads * T_slot

    out3, attn_bht = pl.pallas_call(
        medvidnet_kernel,
        grid=(n_steps,),
        in_specs=[
            pl.BlockSpec((Bblk, T_slot, CHW), lambda i: (i, 0, 0)),      # x_packed
            pl.BlockSpec((Bblk, T_slot, 1), lambda i: (i, 0, 0)),        # vmask
            pl.BlockSpec((Bblk, 1, T_slot), lambda i: (i, 0, 0)),        # amask
            pl.BlockSpec((CHW, F), lambda i: (0, 0)),                    # w_exp
            pl.BlockSpec((1, F), lambda i: (0, 0)),                      # b_enc
            pl.BlockSpec((num_heads, F), lambda i: (0, 0)),              # qh
            pl.BlockSpec((num_heads, F), lambda i: (0, 0)),              # oh
            pl.BlockSpec((F, num_out), lambda i: (0, 0)),                # w_fc
            pl.BlockSpec((1, num_out), lambda i: (0, 0)),                # b_fc
        ],
        out_specs=(
            pl.BlockSpec((Bblk, 1, num_out), lambda i: (i, 0, 0)),       # out
            pl.BlockSpec((Bblk, num_heads, T_slot), lambda i: (i, 0, 0)),  # attn (B,H,T)
        ),
        out_shape=(jax.ShapeDtypeStruct((B_pad, 1, num_out), jnp.float32),
                   jax.ShapeDtypeStruct((B_pad, num_heads, T_slot), jnp.float32)),
        compiler_params=pltpu.CompilerParams(
            dimension_semantics=("parallel",),          # self-contained steps -> v7x 2-TC
            vmem_limit_bytes=vmem_limit,
        ),
        cost_estimate=pl.CostEstimate(flops=int(flops),
                                      transcendentals=int(transcendentals),
                                      bytes_accessed=int(bytes_accessed)),
    )(x_packed, vmask, amask, w_exp, b_enc_f, qh, oh, w_fc_f, b_fc_f)

    out = out3.reshape(B_pad, num_out)[:B]
    attn = jnp.transpose(attn_bht, (2, 0, 1))[:T_pad, :B, :]   # (T_pad, B, H) like torch
    return out, attn


# ------------------------ pure-JAX reference helpers --------------------------

def _pad_frames_ref(h, num_frames):
    """torch pad_sequence equivalent (reference only): (T_pad, B, ...)."""
    T_pad = max(num_frames)
    cols, offp = [], 0
    for n in num_frames:
        hi = h[offp:offp + n]
        pad_width = ((0, T_pad - n),) + ((0, 0),) * (h.ndim - 1)
        cols.append(jnp.pad(hi, pad_width))
        offp += n
    return jnp.stack(cols, axis=1)


# ------------------------------------ main -----------------------------------

if __name__ == "__main__":
    key = jax.random.PRNGKey(0)

    B = 2
    num_frames = [5, 8]                 # frames per video (static)
    C, Himg, Wimg = 4, 16, 16
    F = 32                              # encoder.num_features
    num_heads = 4
    S = F // num_heads                  # subspace_size
    num_out = 1
    scale = math.sqrt(S)
    T_total = sum(num_frames)
    T_pad = max(num_frames)

    ks = jax.random.split(key, 6)
    x = jax.random.normal(ks[0], (T_total, C, Himg, Wimg), jnp.float32)
    w_enc = 0.1 * jax.random.normal(ks[1], (C, F), jnp.float32)
    b_enc = 0.1 * jax.random.normal(ks[2], (1, F), jnp.float32)
    q = jax.random.normal(ks[3], (num_heads, S), jnp.float32)   # attn_query_vecs
    w_fc = 0.1 * jax.random.normal(ks[4], (F, num_out), jnp.float32)
    b_fc = 0.1 * jax.random.normal(ks[5], (1, num_out), jnp.float32)

    params = (w_enc, b_enc, q, w_fc, b_fc)

    out, attn = medvidnet_forward(x, num_frames, params)
    out = jax.block_until_ready(out)
    attn = jax.block_until_ready(attn)
    assert out.shape == (B, num_out)
    assert attn.shape == (T_pad, B, num_heads)

    # -------- pure-JAX f32 reference (mirrors the torch forward) --------
    x_flat = x.reshape(T_total, C, Himg * Wimg)
    h_ref = jnp.mean(x_flat, axis=-1) @ w_enc + b_enc            # encoder (GAP + linear)
    hq = h_ref.reshape(-1, num_heads, S)
    alpha_r = jnp.sum(hq * q[None], axis=-1) / scale             # (T, H)
    alpha_p = _pad_frames_ref(alpha_r, num_frames)               # (T_pad, B, H)
    nf_col = jnp.asarray(num_frames, jnp.int32).reshape(1, B, 1)
    t_ix = jnp.arange(T_pad).reshape(T_pad, 1, 1)
    alpha_p = jnp.where(t_ix >= nf_col, -50.0, alpha_p)
    attn_r = jax.nn.softmax(alpha_p, axis=0)
    hq_pad = _pad_frames_ref(h_ref, num_frames).reshape(T_pad, B, num_heads, S)
    h_vid = jnp.sum(hq_pad * attn_r[..., None], axis=0).reshape(B, F)
    out_r = h_vid @ w_fc + b_fc

    # bf16 inputs in the kernel (f32 accumulation) -> looser tolerance vs f32 reference.
    assert jnp.allclose(attn, attn_r, atol=1e-2, rtol=1e-2)
    assert jnp.allclose(out, out_r, atol=1e-2, rtol=1e-2)
    print("KERNEL_OK")
</pallas_src>

<mosaic_0001>
module attributes {stable_mosaic.version = 11 : i64} {
  func.func @medvidnet_kernel(%arg0: i32, %arg1: memref<2x8x1024xbf16, #tpu.memory_space<vmem>>, %arg2: memref<2x8x1xf32, #tpu.memory_space<vmem>>, %arg3: memref<2x1x8xf32, #tpu.memory_space<vmem>>, %arg4: memref<1024x32xbf16, #tpu.memory_space<vmem>>, %arg5: memref<1x32xf32, #tpu.memory_space<vmem>>, %arg6: memref<4x32xf32, #tpu.memory_space<vmem>>, %arg7: memref<4x32xf32, #tpu.memory_space<vmem>>, %arg8: memref<32x1xf32, #tpu.memory_space<vmem>>, %arg9: memref<1x1xf32, #tpu.memory_space<vmem>>, %arg10: memref<2x1x1xf32, #tpu.memory_space<vmem>>, %arg11: memref<2x4x8xf32, #tpu.memory_space<vmem>>) attributes {dimension_semantics = [#tpu.dimension_semantics<parallel>], iteration_bounds = array<i64: 1>, scalar_prefetch = 0 : i64, scratch_operands = 0 : i64, tpu.core_type = #tpu.core_type<tc>, window_params = [{transform_indices = @transform_0, window_bounds = array<i64: 2, 8, 1024>}, {transform_indices = @transform_1, window_bounds = array<i64: 2, 8, 1>}, {transform_indices = @transform_2, window_bounds = array<i64: 2, 1, 8>}, {pipeline_mode = #tpu.pipeline_mode<synchronous>, transform_indices = @transform_3, window_bounds = array<i64: 1024, 32>}, {pipeline_mode = #tpu.pipeline_mode<synchronous>, transform_indices = @transform_4, window_bounds = array<i64: 1, 32>}, {pipeline_mode = #tpu.pipeline_mode<synchronous>, transform_indices = @transform_5, window_bounds = array<i64: 4, 32>}, {pipeline_mode = #tpu.pipeline_mode<synchronous>, transform_indices = @transform_6, window_bounds = array<i64: 4, 32>}, {pipeline_mode = #tpu.pipeline_mode<synchronous>, transform_indices = @transform_7, window_bounds = array<i64: 32, 1>}, {pipeline_mode = #tpu.pipeline_mode<synchronous>, transform_indices = @transform_8, window_bounds = array<i64: 1, 1>}, {transform_indices = @transform_9, window_bounds = array<i64: 2, 1, 1>}, {transform_indices = @transform_10, window_bounds = array<i64: 2, 4, 8>}]} {
    %c0 = arith.constant 0 : index
    %c0_0 = arith.constant 0 : index
    %c0_1 = arith.constant 0 : index
    %0 = vector.load %arg1[%c0, %c0_0, %c0_1] : memref<2x8x1024xbf16, #tpu.memory_space<vmem>>, vector<2x8x1024xbf16>
    %1 = vector.shape_cast %0 : vector<2x8x1024xbf16> to vector<16x1024xbf16>
    %c0_2 = arith.constant 0 : index
    %c0_3 = arith.constant 0 : index
    %2 = vector.load %arg4[%c0_2, %c0_3] : memref<1024x32xbf16, #tpu.memory_space<vmem>>, vector<1024x32xbf16>
    %cst = arith.constant dense<0.000000e+00> : vector<16x32xf32>
    %3 = tpu.matmul %1, %2, %cst {dimension_numbers = #tpu.dot_dimension_numbers<[1], [0], [0], [1], [0, 0, 1, 1], [], []>} : vector<16x1024xbf16>, vector<1024x32xbf16>, vector<16x32xf32> -> vector<16x32xf32>
    %c0_4 = arith.constant 0 : index
    %c0_5 = arith.constant 0 : index
    %4 = vector.load %arg5[%c0_4, %c0_5] : memref<1x32xf32, #tpu.memory_space<vmem>>, vector<1x32xf32>
    %5 = vector.broadcast %4 : vector<1x32xf32> to vector<16x32xf32>
    %6 = arith.addf %3, %5 : vector<16x32xf32>
    %7 = vector.shape_cast %6 : vector<16x32xf32> to vector<2x8x32xf32>
    %c0_6 = arith.constant 0 : index
    %c0_7 = arith.constant 0 : index
    %c0_8 = arith.constant 0 : index
    %8 = vector.load %arg2[%c0_6, %c0_7, %c0_8] : memref<2x8x1xf32, #tpu.memory_space<vmem>>, vector<2x8x1xf32>
    %9 = vector.broadcast %8 : vector<2x8x1xf32> to vector<2x8x32xf32>
    %10 = arith.mulf %7, %9 : vector<2x8x32xf32>
    %c0_9 = arith.constant 0 : index
    %c0_10 = arith.constant 0 : index
    %11 = vector.load %arg6[%c0_9, %c0_10] : memref<4x32xf32, #tpu.memory_space<vmem>>, vector<4x32xf32>
    %12 = vector.shape_cast %11 : vector<4x32xf32> to vector<1x4x32xf32>
    %13 = vector.shape_cast %12 : vector<1x4x32xf32> to vector<1x4x32xf32>
    %14 = vector.broadcast %13 : vector<1x4x32xf32> to vector<2x4x32xf32>
    "tpu.trace_start"() <{level = 10 : i32, message = "bhf,btf->bht"}> : () -> ()
    %cst_11 = arith.constant dense<0.000000e+00> : vector<2x4x8xf32>
    %15 = tpu.matmul %14, %10, %cst_11 {dimension_numbers = #tpu.dot_dimension_numbers<[2], [2], [1], [1], [0, 0, 0, 1, 1, 1], [0], [0]>} : vector<2x4x32xf32>, vector<2x8x32xf32>, vector<2x4x8xf32> -> vector<2x4x8xf32>
    "tpu.trace_stop"() : () -> ()
    %c0_12 = arith.constant 0 : index
    %c0_13 = arith.constant 0 : index
    %c0_14 = arith.constant 0 : index
    %16 = vector.load %arg3[%c0_12, %c0_13, %c0_14] : memref<2x1x8xf32, #tpu.memory_space<vmem>>, vector<2x1x8xf32>
    %17 = vector.broadcast %16 : vector<2x1x8xf32> to vector<2x4x8xf32>
    %18 = arith.addf %15, %17 : vector<2x4x8xf32>
    %cst_15 = arith.constant dense<0xFF800000> : vector<2x4xf32>
    %19 = vector.multi_reduction <maximumf>, %18, %cst_15 [2] : vector<2x4x8xf32> to vector<2x4xf32>
    %20 = vector.shape_cast %19 : vector<2x4xf32> to vector<2x4x1xf32>
    %21 = vector.broadcast %20 : vector<2x4x1xf32> to vector<2x4x8xf32>
    %22 = arith.subf %18, %21 : vector<2x4x8xf32>
    %23 = math.exp %22 : vector<2x4x8xf32>
    %cst_16 = arith.constant dense<0.000000e+00> : vector<2x4xf32>
    %24 = vector.multi_reduction <add>, %23, %cst_16 [2] : vector<2x4x8xf32> to vector<2x4xf32>
    %25 = vector.shape_cast %24 : vector<2x4xf32> to vector<2x4x1xf32>
    %26 = vector.broadcast %25 : vector<2x4x1xf32> to vector<2x4x8xf32>
    %27 = arith.divf %23, %26 : vector<2x4x8xf32>
    %c0_17 = arith.constant 0 : index
    %c0_18 = arith.constant 0 : index
    %c0_19 = arith.constant 0 : index
    %28 = vector.load %arg11[%c0_17, %c0_18, %c0_19] : memref<2x4x8xf32, #tpu.memory_space<vmem>>, vector<2x4x8xf32>
    tpu.vector_store %arg11[%c0_17, %c0_18, %c0_19], %27 {strides = array<i32>} : memref<2x4x8xf32, #tpu.memory_space<vmem>>, vector<2x4x8xf32>,
    "tpu.trace_start"() <{level = 10 : i32, message = "bht,btf->bhf"}> : () -> ()
    %cst_20 = arith.constant dense<0.000000e+00> : vector<2x4x32xf32>
    %29 = tpu.matmul %27, %10, %cst_20 {dimension_numbers = #tpu.dot_dimension_numbers<[2], [1], [1], [2], [0, 0, 0, 1, 1, 2], [0], [0]>} : vector<2x4x8xf32>, vector<2x8x32xf32>, vector<2x4x32xf32> -> vector<2x4x32xf32>
    "tpu.trace_stop"() : () -> ()
    %c0_21 = arith.constant 0 : index
    %c0_22 = arith.constant 0 : index
    %30 = vector.load %arg7[%c0_21, %c0_22] : memref<4x32xf32, #tpu.memory_space<vmem>>, vector<4x32xf32>
    %31 = vector.shape_cast %30 : vector<4x32xf32> to vector<1x4x32xf32>
    %32 = vector.broadcast %31 : vector<1x4x32xf32> to vector<2x4x32xf32>
    %33 = arith.mulf %29, %32 : vector<2x4x32xf32>
    %cst_23 = arith.constant dense<0.000000e+00> : vector<2x32xf32>
    %34 = vector.multi_reduction <add>, %33, %cst_23 [1] : vector<2x4x32xf32> to vector<2x32xf32>
    %c0_24 = arith.constant 0 : index
    %c0_25 = arith.constant 0 : index
    %35 = vector.load %arg8[%c0_24, %c0_25] : memref<32x1xf32, #tpu.memory_space<vmem>>, vector<32x1xf32>
    %cst_26 = arith.constant dense<0.000000e+00> : vector<2x1xf32>
    %36 = tpu.matmul %34, %35, %cst_26 {dimension_numbers = #tpu.dot_dimension_numbers<[1], [0], [0], [1], [0, 0, 1, 1], [], []>} : vector<2x32xf32>, vector<32x1xf32>, vector<2x1xf32> -> vector<2x1xf32>
    %c0_27 = arith.constant 0 : index
    %c0_28 = arith.constant 0 : index
    %37 = vector.load %arg9[%c0_27, %c0_28] : memref<1x1xf32, #tpu.memory_space<vmem>>, vector<1x1xf32>
    %38 = vector.broadcast %37 : vector<1x1xf32> to vector<2x1xf32>
    %39 = arith.addf %36, %38 : vector<2x1xf32>
    %40 = vector.shape_cast %39 : vector<2x1xf32> to vector<2x1x1xf32>
    %c0_29 = arith.constant 0 : index
    %c0_30 = arith.constant 0 : index
    %c0_31 = arith.constant 0 : index
    %41 = vector.load %arg10[%c0_29, %c0_30, %c0_31] : memref<2x1x1xf32, #tpu.memory_space<vmem>>, vector<2x1x1xf32>
    tpu.vector_store %arg10[%c0_29, %c0_30, %c0_31], %40 {strides = array<i32>} : memref<2x1x1xf32, #tpu.memory_space<vmem>>, vector<2x1x1xf32>,
    return
  }
  func.func @transform_0(%arg0: i32) -> (i32, i32, i32) {
    %c0_i32 = arith.constant 0 : i32
    %c0_i32_0 = arith.constant 0 : i32
    %c0_i32_1 = arith.constant 0 : i32
    return %arg0, %c0_i32, %c0_i32_0 : i32, i32, i32
  }
  func.func @transform_1(%arg0: i32) -> (i32, i32, i32) {
    %c0_i32 = arith.constant 0 : i32
    %c0_i32_0 = arith.constant 0 : i32
    %c0_i32_1 = arith.constant 0 : i32
    return %arg0, %c0_i32, %c0_i32_0 : i32, i32, i32
  }
  func.func @transform_2(%arg0: i32) -> (i32, i32, i32) {
    %c0_i32 = arith.constant 0 : i32
    %c0_i32_0 = arith.constant 0 : i32
    %c0_i32_1 = arith.constant 0 : i32
    return %arg0, %c0_i32, %c0_i32_0 : i32, i32, i32
  }
  func.func @transform_3(%arg0: i32) -> (i32, i32) {
    %c0_i32 = arith.constant 0 : i32
    %c0_i32_0 = arith.constant 0 : i32
    %c0_i32_1 = arith.constant 0 : i32
    return %c0_i32, %c0_i32_0 : i32, i32
  }
  func.func @transform_4(%arg0: i32) -> (i32, i32) {
    %c0_i32 = arith.constant 0 : i32
    %c0_i32_0 = arith.constant 0 : i32
    %c0_i32_1 = arith.constant 0 : i32
    return %c0_i32, %c0_i32_0 : i32, i32
  }
  func.func @transform_5(%arg0: i32) -> (i32, i32) {
    %c0_i32 = arith.constant 0 : i32
    %c0_i32_0 = arith.constant 0 : i32
    %c0_i32_1 = arith.constant 0 : i32
    return %c0_i32, %c0_i32_0 : i32, i32
  }
  func.func @transform_6(%arg0: i32) -> (i32, i32) {
    %c0_i32 = arith.constant 0 : i32
    %c0_i32_0 = arith.constant 0 : i32
    %c0_i32_1 = arith.constant 0 : i32
    return %c0_i32, %c0_i32_0 : i32, i32
  }
  func.func @transform_7(%arg0: i32) -> (i32, i32) {
    %c0_i32 = arith.constant 0 : i32
    %c0_i32_0 = arith.constant 0 : i32
    %c0_i32_1 = arith.constant 0 : i32
    return %c0_i32, %c0_i32_0 : i32, i32
  }
  func.func @transform_8(%arg0: i32) -> (i32, i32) {
    %c0_i32 = arith.constant 0 : i32
    %c0_i32_0 = arith.constant 0 : i32
    %c0_i32_1 = arith.constant 0 : i32
    return %c0_i32, %c0_i32_0 : i32, i32
  }
  func.func @transform_9(%arg0: i32) -> (i32, i32, i32) {
    %c0_i32 = arith.constant 0 : i32
    %c0_i32_0 = arith.constant 0 : i32
    %c0_i32_1 = arith.constant 0 : i32
    return %arg0, %c0_i32, %c0_i32_0 : i32, i32, i32
  }
  func.func @transform_10(%arg0: i32) -> (i32, i32, i32) {
    %c0_i32 = arith.constant 0 : i32
    %c0_i32_0 = arith.constant 0 : i32
    %c0_i32_1 = arith.constant 0 : i32
    return %arg0, %c0_i32, %c0_i32_0 : i32, i32, i32
  }
}

</mosaic_0001>

<bundles_post_ra>
// kernel: tpu_custom_call.1
= control target key start
LH: loop header
LB: loop body
LE: loop exit
PB: predicated region body
PF: predicated region fallthrough
CT: control target
= control target key end

     0   :  { %s1942_s0 = inlined_call_operand.vmem [shape: bf16[2,8,1024], index: 0, kind: input, shape index: {}]   ;;  %s1943_s1 = inlined_call_operand.vmem [shape: f32[2,8,1], index: 1, kind: input, shape index: {}]   ;;  %s1944_s2 = inlined_call_operand.vmem [shape: f32[2,1,8], index: 2, kind: input, shape index: {}]   ;;  %s1945_s3 = inlined_call_operand.vmem [shape: bf16[1024,32], index: 3, kind: input, shape index: {}]   ;;  %s1946_s4 = inlined_call_operand.vmem [shape: f32[1,32], index: 4, kind: input, shape index: {}]   ;;  %s1947_s5 = inlined_call_operand.vmem [shape: f32[4,32], index: 5, kind: input, shape index: {}]   ;;  %s1948_s6 = inlined_call_operand.vmem [shape: f32[4,32], index: 6, kind: input, shape index: {}]   ;;  %s1949_s7 = inlined_call_operand.vmem [shape: f32[32,1], index: 7, kind: input, shape index: {}]   ;;  %s1950_s8 = inlined_call_operand.<no memory space> [shape: f32[1,1], index: 8, kind: input, shape index: {}]   ;;  %s1951_s9 = inlined_call_operand.vmem [shape: f32[2,1,1], index: 9, kind: output, shape index: {0}]   ;;  %s1952_s10 = inlined_call_operand.hbm [shape: f32[2,4,8], index: 10, kind: output, shape index: {1}]  }
   0x1   :  { %v16_v0 = vstv %s1950_s8 }
   0x2   :  { %17 = vst [vmem:[#allocation2] sm:$0x1] %v16_v0 }
   0x3   :  { %v1496_v1 = vld [vmem:[%s1945_s3 + $0x78] sm:$0xff]   ;;  %v1590_v3 = vmov 0   ;;  %v1500_v6 = vld [vmem:[%s1945_s3 + $0x70] sm:$0xff]   ;;  %v1504_v10 = vld [vmem:[%s1945_s3 + $0x68] sm:$0xff]  }
   0x4   :  { %v1497_v2 = vld [vmem:[%s1945_s3 + $0xf8] sm:$0xff]   ;;  %1495 = vset.pattern.permute.xlu0 %v1590_v3  ;;  %1356 = vmatprep.subr.bf16.mxu0 %v1496_v1  ;;  %v1501_v7 = vld [vmem:[%s1945_s3 + $0xf0] sm:$0xff]   ;;  %v1505_v11 = vld [vmem:[%s1945_s3 + $0xe8] sm:$0xff]  }
   0x5   :  { %v1498_v4 = vld [vmem:[%s1945_s3 + $0x38] sm:$0xff]   ;;  %1378 = vmatprep.subr.bf16.mxu1 %v1497_v2  ;;  %v1502_v8 = vld [vmem:[%s1945_s3 + $0x30] sm:$0xff]   ;;  %v1506_v12 = vld [vmem:[%s1945_s3 + $0x28] sm:$0xff]  }
   0x6   :  { %v1499_v5 = vld [vmem:[%s1945_s3 + $0xb8] sm:$0xff]   ;;  %1357 = vmatpush3.bf16.msra.mxu0 %v1498_v4  ;;  %v1503_v9 = vld [vmem:[%s1945_s3 + $0xb0] sm:$0xff]   ;;  %v1507_v13 = vld [vmem:[%s1945_s3 + $0xa8] sm:$0xff]  }
   0x7   :  { %1379 = vmatpush3.bf16.msra.mxu1 %v1499_v5  ;;  %1358 = vmatprep.subr.bf16.mxu0 %v1500_v6  ;;  %v1508_v14 = vld [vmem:[%s1945_s3 + $0x60] sm:$0xff]   ;;  %v1512_v18 = vld [vmem:[%s1945_s3 + $0x58] sm:$0xff]   ;;  %v1516_v22 = vld [vmem:[%s1945_s3 + $0x50] sm:$0xff]  }
   0x8   :  { %1380 = vmatprep.subr.bf16.mxu1 %v1501_v7  ;;  %v1509_v15 = vld [vmem:[%s1945_s3 + $0xe0] sm:$0xff]   ;;  %v1513_v19 = vld [vmem:[%s1945_s3 + $0xd8] sm:$0xff]   ;;  %v1517_v23 = vld [vmem:[%s1945_s3 + $0xd0] sm:$0xff]  }
   0x9   :  { %v1510_v16 = vld [vmem:[%s1945_s3 + $0x20] sm:$0xff]   ;;  %v1514_v20 = vld [vmem:[%s1945_s3 + $0x18] sm:$0xff]   ;;  %v1518_v24 = vld [vmem:[%s1945_s3 + $0x10] sm:$0xff]  }
   0xa   :  { %1359 = vmatpush3.bf16.msra.mxu0 %v1502_v8  ;;  %v1511_v17 = vld [vmem:[%s1945_s3 + $0xa0] sm:$0xff]   ;;  %v1515_v21 = vld [vmem:[%s1945_s3 + $0x98] sm:$0xff]   ;;  %v1519_v25 = vld [vmem:[%s1945_s3 + $0x90] sm:$0xff]  }
   0xb   :  { %1381 = vmatpush3.bf16.msra.mxu1 %v1503_v9  ;;  %1360 = vmatprep.subr.bf16.mxu0 %v1504_v10  ;;  %v1520_v26 = vld [vmem:[%s1945_s3 + $0x48] sm:$0xff]   ;;  %v1524_v30 = vld [vmem:[%s1945_s3 + $0x40] sm:$0xff]   ;;  %v1528_v42 = vld [vmem:[%s1945_s3 + $0x178] sm:$0xff]  }
   0xc   :  { %1382 = vmatprep.subr.bf16.mxu1 %v1505_v11  ;;  %v1521_v27 = vld [vmem:[%s1945_s3 + $0xc8] sm:$0xff]   ;;  %v1525_v31 = vld [vmem:[%s1945_s3 + $0xc0] sm:$0xff]   ;;  %v1529_v43 = vld [vmem:[%s1945_s3 + $0x1f8] sm:$0xff]  }
   0xd   :  { %v1522_v28 = vld [vmem:[%s1945_s3 + $0x8] sm:$0xff]   ;;  %v1526_v32 = vld [vmem:[%s1945_s3] sm:$0xff]   ;;  %v1530_v44 = vld [vmem:[%s1945_s3 + $0x138] sm:$0xff]  }
   0xe   :  { %1361 = vmatpush3.bf16.msra.mxu0 %v1506_v12  ;;  %v1523_v29 = vld [vmem:[%s1945_s3 + $0x88] sm:$0xff]   ;;  %v1527_v33 = vld [vmem:[%s1945_s3 + $0x80] sm:$0xff]   ;;  %v1531_v45 = vld [vmem:[%s1945_s3 + $0x1b8] sm:$0xff]  }
   0xf   :  { %1383 = vmatpush3.bf16.msra.mxu1 %v1507_v13  ;;  %1362 = vmatprep.subr.bf16.mxu0 %v1508_v14  ;;  %v38_v34 = vld [vmem:[%s1942_s0] sm:$0xff]  ;;  %v39_v36 = vld [vmem:[%s1942_s0 + $0x8] sm:$0xff]  ;;  %v1532_v46 = vld [vmem:[%s1945_s3 + $0x170] sm:$0xff]  }
  0x10   :  { %1384 = vmatprep.subr.bf16.mxu1 %v1509_v15  ;;  %v42_v35 = vld [vmem:[%s1942_s0 + $0x20] sm:$0xff]  ;;  %v43_v39 = vld [vmem:[%s1942_s0 + $0x28] sm:$0xff]  ;;  %v1533_v47 = vld [vmem:[%s1945_s3 + $0x1f0] sm:$0xff]  }
  0x11   :  { %v1274_v37 = vcombine.low %v38_v34, %v42_v35  ;;  %v1275_v38 = vcombine.high %v38_v34, %v42_v35  ;;  %v1276_v40 = vcombine.low %v39_v36, %v43_v39  ;;  %v1277_v41 = vcombine.high %v39_v36, %v43_v39  ;;  %v1534_v48 = vld [vmem:[%s1945_s3 + $0x130] sm:$0xff]   ;;  %v1536_v50 = vld [vmem:[%s1945_s3 + $0x168] sm:$0xff]   ;;  %v1540_v54 = vld [vmem:[%s1945_s3 + $0x160] sm:$0xff]  }
  0x12   :  { %1363 = vmatpush3.bf16.msra.mxu0 %v1510_v16  ;;  %v1535_v49 = vld [vmem:[%s1945_s3 + $0x1b0] sm:$0xff]   ;;  %v1537_v51 = vld [vmem:[%s1945_s3 + $0x1e8] sm:$0xff]   ;;  %v1541_v55 = vld [vmem:[%s1945_s3 + $0x1e0] sm:$0xff]  }
  0x13   :  { %1385 = vmatpush3.bf16.msra.mxu1 %v1511_v17  ;;  %1364 = vmatprep.subr.bf16.mxu0 %v1512_v18  ;;  %v1538_v52 = vld [vmem:[%s1945_s3 + $0x128] sm:$0xff]   ;;  %v1542_v56 = vld [vmem:[%s1945_s3 + $0x120] sm:$0xff]   ;;  %v1544_v58 = vld [vmem:[%s1945_s3 + $0x158] sm:$0xff]  }
  0x14   :  { %1386 = vmatprep.subr.bf16.mxu1 %v1513_v19  ;;  %637 = vmatprep.mubr.bf16.mxu0 %v1275_v38  ;;  %v1539_v53 = vld [vmem:[%s1945_s3 + $0x1a8] sm:$0xff]   ;;  %v1543_v57 = vld [vmem:[%s1945_s3 + $0x1a0] sm:$0xff]   ;;  %v1545_v59 = vld [vmem:[%s1945_s3 + $0x1d8] sm:$0xff]  }
  0x15   :  { %678 = vmatprep.mubr.bf16.mxu1 %v1277_v41  ;;  %v1546_v60 = vld [vmem:[%s1945_s3 + $0x118] sm:$0xff]   ;;  %v1548_v62 = vld [vmem:[%s1945_s3 + $0x150] sm:$0xff]   ;;  %v1552_v2 = vld [vmem:[%s1945_s3 + $0x148] sm:$0xff]  }
  0x16   :  { %1365 = vmatpush3.bf16.msra.mxu0 %v1514_v20  ;;  %v1547_v61 = vld [vmem:[%s1945_s3 + $0x198] sm:$0xff]   ;;  %v1549_v63 = vld [vmem:[%s1945_s3 + $0x1d0] sm:$0xff]   ;;  %v1553_v3 = vld [vmem:[%s1945_s3 + $0x1c8] sm:$0xff]  }
  0x17   :  { %1387 = vmatpush3.bf16.msra.mxu1 %v1515_v21  ;;  %1366 = vmatprep.subr.bf16.mxu0 %v1516_v22  ;;  %v1550_v0 = vld [vmem:[%s1945_s3 + $0x110] sm:$0xff]   ;;  %v1554_v4 = vld [vmem:[%s1945_s3 + $0x108] sm:$0xff]   ;;  %v1556_v6 = vld [vmem:[%s1945_s3 + $0x140] sm:$0xff]  }
  0x18   :  { %1388 = vmatprep.subr.bf16.mxu1 %v1517_v23  ;;  %v1551_v1 = vld [vmem:[%s1945_s3 + $0x190] sm:$0xff]   ;;  %v1555_v5 = vld [vmem:[%s1945_s3 + $0x188] sm:$0xff]   ;;  %v1557_v7 = vld [vmem:[%s1945_s3 + $0x1c0] sm:$0xff]  }
  0x19   :  { %v1558_v8 = vld [vmem:[%s1945_s3 + $0x100] sm:$0xff]   ;;  %v40_v10 = vld [vmem:[%s1942_s0 + $0x10] sm:$0xff]  ;;  %v41_v14 = vld [vmem:[%s1942_s0 + $0x18] sm:$0xff] }
  0x1a   :  { %1367 = vmatpush3.bf16.msra.mxu0 %v1518_v24  ;;  %v1559_v9 = vld [vmem:[%s1945_s3 + $0x180] sm:$0xff]   ;;  %v44_v11 = vld [vmem:[%s1942_s0 + $0x30] sm:$0xff]  ;;  %v45_v15 = vld [vmem:[%s1942_s0 + $0x38] sm:$0xff] }
  0x1b   :  { %1389 = vmatpush3.bf16.msra.mxu1 %v1519_v25  ;;  %1368 = vmatprep.subr.bf16.mxu0 %v1520_v26  ;;  %v1278_v12 = vcombine.low %v40_v10, %v44_v11  ;;  %v1279_v13 = vcombine.high %v40_v10, %v44_v11  ;;  %v769_v16 = vld [vmem:[%s1943_s1] sm:$0xff]  ;;  %v1280_v17 = vcombine.low %v41_v14, %v45_v15 }
  0x1c   :  { %1390 = vmatprep.subr.bf16.mxu1 %v1521_v27  ;;  %v1281_v18 = vcombine.high %v41_v14, %v45_v15  ;;  %773 = vperm.xlu0 %1495, %v769_v16  }
  0x1e   :  { %1369 = vmatpush3.bf16.msra.mxu0 %v1522_v28 }
  0x1f   :  { %1391 = vmatpush3.bf16.msra.mxu1 %v1523_v29  ;;  %1370 = vmatprep.subr.bf16.mxu0 %v1524_v30 }
  0x20   :  { %1392 = vmatprep.subr.bf16.mxu1 %v1525_v31 }
  0x22   :  { %1371 = vmatpush3.bf16.msra.mxu0 %v1526_v32 }
  0x23   :  { %1393 = vmatpush3.bf16.msra.mxu1 %v1527_v33  ;;  %1400 = vmatprep.subr.bf16.mxu0 %v1528_v42 }
  0x24   :  { %1422 = vmatprep.subr.bf16.mxu1 %v1529_v43 }
  0x25   :  { %638 = vmatmul.mubr.bf16.vlgmr.msra.gmra.mxu0 %v1274_v37 }
  0x26   :  { %679 = vmatmul.mubr.bf16.vlgmr.msra.gmra.mxu1 %v1276_v40  ;;  %1401 = vmatpush3.bf16.msra.mxu0 %v1530_v44 }
  0x27   :  { %1423 = vmatpush3.bf16.msra.mxu1 %v1531_v45  ;;  %1402 = vmatprep.subr.bf16.mxu0 %v1532_v46 }
  0x28   :  { %1424 = vmatprep.subr.bf16.mxu1 %v1533_v47 }
  0x2a   :  { %1403 = vmatpush3.bf16.msra.mxu0 %v1534_v48 }
  0x2b   :  { %1425 = vmatpush3.bf16.msra.mxu1 %v1535_v49  ;;  %1404 = vmatprep.subr.bf16.mxu0 %v1536_v50 }
  0x2c   :  { %1426 = vmatprep.subr.bf16.mxu1 %v1537_v51 }
  0x2e   :  { %1405 = vmatpush3.bf16.msra.mxu0 %v1538_v52 }
  0x2f   :  { %1427 = vmatpush3.bf16.msra.mxu1 %v1539_v53  ;;  %1406 = vmatprep.subr.bf16.mxu0 %v1540_v54 }
  0x30   :  { %1428 = vmatprep.subr.bf16.mxu1 %v1541_v55 }
  0x32   :  { %1407 = vmatpush3.bf16.msra.mxu0 %v1542_v56 }
  0x33   :  { %1429 = vmatpush3.bf16.msra.mxu1 %v1543_v57  ;;  %1408 = vmatprep.subr.bf16.mxu0 %v1544_v58 }
  0x34   :  { %1430 = vmatprep.subr.bf16.mxu1 %v1545_v59 }
  0x36   :  { %1409 = vmatpush3.bf16.msra.mxu0 %v1546_v60 }
  0x37   :  { %1431 = vmatpush3.bf16.msra.mxu1 %v1547_v61  ;;  %1410 = vmatprep.subr.bf16.mxu0 %v1548_v62 }
  0x38   :  { %1432 = vmatprep.subr.bf16.mxu1 %v1549_v63 }
  0x3a   :  { %1411 = vmatpush3.bf16.msra.mxu0 %v1550_v0 }
  0x3b   :  { %1433 = vmatpush3.bf16.msra.mxu1 %v1551_v1  ;;  %1412 = vmatprep.subr.bf16.mxu0 %v1552_v2 }
  0x3c   :  { %1434 = vmatprep.subr.bf16.mxu1 %v1553_v3 }
  0x3e   :  { %1413 = vmatpush3.bf16.msra.mxu0 %v1554_v4 }
  0x3f   :  { %1435 = vmatpush3.bf16.msra.mxu1 %v1555_v5  ;;  %1414 = vmatprep.subr.bf16.mxu0 %v1556_v6 }
  0x40   :  { %1436 = vmatprep.subr.bf16.mxu1 %v1557_v7 }
  0x42   :  { %1415 = vmatpush3.bf16.msra.mxu0 %v1558_v8 }
  0x43   :  { %1437 = vmatpush3.bf16.msra.mxu1 %v1559_v9 }
  0x44   :  { %18 = vsyncpa [#allocation4], 0  ;;  %719 = vmatprep.mubr.bf16.mxu0 %v1279_v13  ;;  %v770_v19 = vld [vmem:[%s1943_s1 + $0x8] sm:$0xff]  ;;  %760 = vmatprep.mubr.bf16.mxu1 %v1281_v18  ;;  %v1591_v20 = vmov 0.0   ;;  %vm1592_vm0 = vmmov 0   ;;  %vm798_vm1 = vcmask 261120  }
  0x45   :  { %720 = vmatmul.mubr.bf16.vlgmr.msra.gmra.mxu0 %v1278_v12  ;;  %778 = vperm.xlu0 %1495, %v770_v19   ;;  %v1273_v28 = vld [vmem:[%s1946_s4] ss:$0 sm:$0xff]  ;;  %vm948_vm2 = vcmask 60416   ;;  %v1347_v63 = vld [vmem:[%s1944_s2 + $0x1] ss:$0 sm:$0xff]  ;;  %vm973_vm3 = vcmask 64512  }
  0x46   :  { %761 = vmatmul.mubr.bf16.vlgmr.msra.gmra.mxu1 %v1280_v17  ;;  %1457 = vmatprep.subr.mxu1 %v1591_v20  ;;  %v783_v56 = vld [vmem:[%s1947_s5] sm:$0xf]  ;;  %vm1123_vm4 = vcmask 257024   ;;  %vm1151_vm5 = vcmask 1041409  }
  0x47   :  { %1467 = vmatprep.subr.mxu0 %v1591_v20  ;;  %1459 = vmatprep.mubr.msk.f32.mxu1 %vm1592_vm0, %v1591_v20  ;;  %v1346_v59 = vld [vmem:[%s1944_s2] ss:$0 sm:$0xff] }
  0x48   :  { %1469 = vmatprep.mubr.msk.f32.mxu0 %vm1592_vm0, %v1591_v20 }
  0x97   :  { %v774_v46 = vpop.permute.xlu0 %773 }
  0xc0   :  { %v779_v57 = vpop.permute.xlu0 %778 }
  0xe5   :  { %v1372_v21 = vpop.f32.mrf.mxu0 }
  0xe6   :  { %v1394_v22 = vpop.f32.mrf.mxu1 }
  0xe7   :  { %v1373_v23 = vpop.f32.mrf.mxu0 }
  0xe8   :  { %v1395_v24 = vpop.f32.mrf.mxu1  ;;  %v1374_v26 = vadd.f32 %v1373_v23, %v1372_v21  ;;  %v1140_v23 = vld [vmem:[%s1949_s7 + $0x10] sm:$0xff] }
  0xe9   :  { %v1375_v25 = vpop.f32.mrf.mxu0  ;;  %v1396_v31 = vadd.f32 %v1395_v24, %v1394_v22  ;;  %v1141_v22 = vld [vmem:[%s1949_s7 + $0x18] sm:$0xff]  ;;  %v1139_v24 = vld [vmem:[%s1949_s7 + $0x8] sm:$0xff] }
  0xea   :  { %v1397_v27 = vpop.f32.mrf.mxu1  ;;  %v640_v30 = vadd.f32 %v1374_v26, %v1273_v28  ;;  %v1120_v26 = vld [vmem:[%s1948_s6] sm:$0xf]  ;;  %s1593_s6 = smov [#allocation3]  }
  0xeb   :  { %v1376_v29 = vpop.f32.mrf.mxu0 }
  0xec   :  { %v1377_v32 = vadd.f32 %v1376_v29, %v1375_v25  ;;  %v1398_v33 = vpop.f32.mrf.mxu1  ;;  %v681_v37 = vadd.f32 %v1396_v31, %v640_v30  ;;  %v1138_v25 = vld [vmem:[%s1949_s7] sm:$0xff]  ;;  %s1260_s7 = sshll.u32 %s1593_s6, 4  ;;  %s1261_s7 = int_to_ptr.vmem [resolvable:$true] %s1260_s7 }
  0xed   :  { %v1399_v42 = vadd.f32 %v1398_v33, %v1397_v27  ;;  %s1568_s27 = scalar_lea.vmem %s1261_s7, 128  ;;  %p1573_p1 = scmp.lt.s32.totalorder %s1261_s7, %s1261_s7 }
  0xee   :  { %v643_v38 = vadd.f32 %v1377_v32, %v1273_v28  ;;  %p1569_p0 = scmp.ne.s32.totalorder %s1261_s7, %s1568_s27  ;;  %p1574_p2 = scmp.lt.s32.totalorder %s1568_s27, %s1568_s27 }
  0xf0   :  { %v684_v48 = vadd.f32 %v1399_v42, %v643_v38  ;;  %p1575_p3 = por %p1574_p2, %p1573_p1 }
  0xf2   :  { %p1576_p4 = pnand %p1575_p3, %p1569_p0 }
 0x105   :  { %v1416_v34 = vpop.f32.mrf.mxu0 }
 0x106   :  { %v1438_v35 = vpop.f32.mrf.mxu1 }
 0x107   :  { %v1417_v36 = vpop.f32.mrf.mxu0 }
 0x108   :  { %v1418_v39 = vadd.f32 %v1417_v36, %v1416_v34  ;;  %v1439_v40 = vpop.f32.mrf.mxu1 }
 0x109   :  { %v1419_v41 = vpop.f32.mrf.mxu0  ;;  %v1440_v44 = vadd.f32 %v1439_v40, %v1438_v35 }
 0x10a   :  { %v722_v43 = vadd.f32 %v1418_v39, %v681_v37  ;;  %v1441_v45 = vpop.f32.mrf.mxu1 }
 0x10b   :  { %v1420_v47 = vpop.f32.mrf.mxu0 }
 0x10c   :  { %v763_v49 = vadd.f32 %v1440_v44, %v722_v43  ;;  %v1421_v50 = vadd.f32 %v1420_v47, %v1419_v41  ;;  %v1442_v51 = vpop.f32.mrf.mxu1 }
 0x10d   :  { %v1443_v54 = vadd.f32 %v1442_v51, %v1441_v45 }
 0x10e   :  { %v781_v52 = vmul.f32 %v774_v46, %v763_v49  ;;  %v725_v53 = vadd.f32 %v1421_v50, %v684_v48 }
 0x110   :  { %v766_v55 = vadd.f32 %v1443_v54, %v725_v53  ;;  %1458 = vmatpush3.xpose.msk.msra.mxu1 %vm798_vm1, %v781_v52  ;;  %1468 = vmatpush3.msra.mxu0 %v781_v52 }
 0x111   :  { %1462 = vmatprep.subr.mxu1 %v1591_v20  ;;  %1477 = vmatprep.subr.mxu0 %v1591_v20 }
 0x112   :  { %v782_v58 = vmul.f32 %v779_v57, %v766_v55 }
 0x113   :  { %1460 = vmatmul.mubr.msk.f32.vlgmr.msra.gmra.mxu1 %vm798_vm1, %v783_v56 }
 0x114   :  { %1463 = vmatpush3.xpose.msk.msra.mxu1 %vm798_vm1, %v782_v58  ;;  %1464 = vmatprep.mubr.msk.f32.mxu1 %vm1592_vm0, %v1591_v20 }
 0x115   :  { %1472 = vmatprep.subr.mxu1 %v1591_v20 }
 0x117   :  { %1465 = vmatmul.mubr.msk.f32.vlgmr.msra.gmra.mxu1 %vm798_vm1, %v783_v56 }
 0x118   :  { %1473 = vmatpush3.msra.mxu1 %v782_v58  ;;  %1474 = vmatprep.mubr.msk.f32.mxu1 %vm1592_vm0, %v1591_v20 }
 0x1d3   :  { %v871_v60 = vpop.f32.mrf.mxu1 }
 0x1d4   :  { %v872_v61 = vadd.f32 %v1346_v59, %v871_v60 }
 0x1d5   :  { %v1461_v62 = vpop.f32.mrf.mxu1 }
 0x1d6   :  { %v949_v0 = vsel %vm948_vm2, %v872_v61, -inf }
 0x1d7   :  { %950 = vmax.xlane.f32.xlu1 %v949_v0  ;;  %v944_v1 = vpop.f32.mrf.mxu1 }
 0x1d8   :  { %v945_v2 = vadd.f32 %v1347_v63, %v944_v1 }
 0x1d9   :  { %v1466_v3 = vpop.f32.mrf.mxu1 }
 0x1da   :  { %v952_v4 = vsel %vm948_vm2, %v945_v2, -inf }
 0x1db   :  { %953 = vmax.xlane.f32.xlu1 %v952_v4 }
 0x260   :  { %v951_v5 = vpop.xlane.xlu1 %950 }
 0x261   :  { %v955_v6 = vsub.f32 %v872_v61, %v951_v5 }
 0x263   :  { %v957_v7 = vmul.f32 1.442695, %v955_v6 }
 0x264   :  { %v954_v8 = vpop.xlane.xlu1 %953 }
 0x265   :  { %1560 = vpow2.f32 %v957_v7  ;;  %v956_v9 = vsub.f32 %v945_v2, %v954_v8 }
 0x267   :  { %v959_v10 = vmul.f32 1.442695, %v956_v9 }
 0x269   :  { %1562 = vpow2.f32 %v959_v10 }
 0x272   :  { %v1561_v11 = vpop.eup %1560 }
 0x273   :  { %v961_v12 = vsel %vm948_vm2, %v1561_v11, 0.0 }
 0x274   :  { %962 = vadd.xlane.f32.xlu0 %v961_v12 }
 0x276   :  { %v1563_v13 = vpop.eup %1562 }
 0x277   :  { %v964_v14 = vsel %vm948_vm2, %v1563_v13, 0.0 }
 0x278   :  { %965 = vadd.xlane.f32.xlu1 %v964_v14 }
 0x2fd   :  { %v963_v15 = vpop.xlane.xlu0 %962 }
 0x2fe   :  { %1564 = vrcp.f32 %v963_v15 }
 0x301   :  { %v966_v16 = vpop.xlane.xlu1 %965 }
 0x302   :  { %1566 = vrcp.f32 %v966_v16 }
 0x30b   :  { %v1565_v17 = vpop.eup %1564 }
 0x30c   :  { %v968_v18 = vmul.f32 %v1565_v17, %v1561_v11 }
 0x30e   :  { %1470 = vmatmul.mubr.msk.f32.vlgmr.msra.gmra.mxu0 %vm973_vm3, %v968_v18  ;;  %971 = vst.msk [vmem:[#allocation3] sm:$0xf] %vm948_vm2, %v968_v18 }
 0x30f   :  { %v1567_v19 = vpop.eup %1566  ;;  %1485 = vmatprep.mubr.msk.f32.mxu0 %vm1592_vm0, %v1591_v20  ;;  %1478 = vmatpush3.msra.mxu0 %v1141_v22 }
 0x310   :  { %v970_v21 = vmul.f32 %v1567_v19, %v1563_v13  ;;  %1479 = vmatprep.subr.mxu0 %v1591_v20 }
 0x311   :  { %1480 = vmatpush3.msra.mxu0 %v1140_v23 }
 0x312   :  { %1475 = vmatmul.mubr.msk.f32.vlgmr.msra.gmra.mxu1 %vm973_vm3, %v970_v21  ;;  %972 = vst.msk [vmem:[#allocation3 + $0x4] sm:$0xf] %vm948_vm2, %v970_v21  ;;  %1481 = vmatprep.subr.mxu0 %v1591_v20 }
 0x313   :  { %1482 = vmatpush3.msra.mxu0 %v1139_v24 }
 0x314   :  { %1483 = vmatprep.subr.mxu0 %v1591_v20 }
 0x315   :  { %1484 = vmatpush3.msra.mxu0 %v1138_v25 }
 0x3ce   :  { %v1043_v27 = vpop.f32.mrf.mxu0 }
 0x3cf   :  { %v1121_v28 = vmul.f32 %v1120_v26, %v1043_v27 }
 0x3d0   :  { %v1471_v29 = vpop.f32.mrf.mxu0 }
 0x3d1   :  { %v1124_v30 = vsel %vm1123_vm4, %v1121_v28, 0.0 }
 0x3d2   :  { %v1125_v31 = vrot.slane %v1124_v30, 4  ;;  %v1116_v32 = vpop.f32.mrf.mxu1 }
 0x3d3   :  { %v1122_v33 = vmul.f32 %v1120_v26, %v1116_v32 }
 0x3d4   :  { %v1126_v34 = vadd.f32 %v1125_v31, %v1124_v30  ;;  %v1476_v35 = vpop.f32.mrf.mxu1 }
 0x3d5   :  { %v1131_v36 = vsel %vm1123_vm4, %v1122_v33, 0.0 }
 0x3d6   :  { %v1127_v37 = vrot.slane %v1126_v34, 2  ;;  %v1132_v38 = vrot.slane %v1131_v36, 4 }
 0x3d8   :  { %v1128_v39 = vadd.f32 %v1127_v37, %v1126_v34  ;;  %v1133_v20 = vadd.f32 %v1132_v38, %v1131_v36 }
 0x3da   :  { %v1134_v40 = vrot.slane %v1133_v20, 2  ;;  %v1129_v41 = vrot.slane %v1128_v39, 1 }
 0x3dc   :  { %v1135_v42 = vadd.f32 %v1134_v40, %v1133_v20  ;;  %v1130_v44 = vadd.f32 %v1129_v41, %v1128_v39 }
 0x3de   :  { %v1136_v43 = vrot.slane %v1135_v42, 1 }
 0x3e0   :  { %v1137_v45 = vadd.f32 %v1136_v43, %v1135_v42 }
 0x3e2   :  { %v1152_v46 = vsel %vm1151_vm5, %v1137_v45, %v1130_v44 }
 0x3e3   :  { %1486 = vmatmul.mubr.msk.f32.vlgmr.msra.gmra.mxu0 %vm798_vm1, %v1152_v46 }
 0x3e4   :  { %1579 = shalt.err (!%p1576_p4)
}
 0x3e5   :  { %s1594_s28 = smov 64   ;;  %s1595_s29 = smov 4   ;;  %v1596_v47 = vmov 1966171168   ;;  %v1229_v49 = vlaneseq  ;;  %v1354_v52 = vld [vmem:[#allocation2] ss:$0 sm:$0xff] }
 0x3e6   :  { %1266 = dma.vmem_to_hbm [thread:$0]  %s1261_s7, 128, %s1952_s10, [#allocation4], %s1594_s28, %s1594_s28, %s1595_s29   ;;  %v1227_v48 = vunpack.c.l.s4 %v1596_v47  ;;  %vm1250_vm6 = vcmask 0  }
 0x3e7   :  { %v1230_v51 = vshrl.u32 %v1229_v49, 7 }
 0x3e8   :  { %v1228_v50 = vunpack.c.0.s8 %v1227_v48 }
 0x3ea   :  { %v1231_v53 = vsub.s32 %v1228_v50, %v1230_v51 }
 0x4a3   :  { %v1221_v54 = vpop.f32.mrf.mxu0 }
 0x4a4   :  { %v1222_v55 = vadd.f32 %v1354_v52, %v1221_v54 }
 0x4a5   :  { %v1487_v56 = vpop.f32.mrf.mxu0 }
 0x4a6   :  { %v1232_v57 = vrot.slane %v1222_v55, %v1231_v53 }
 0x4a8   :  { %v1233_v58 = vcombine.high %v1232_v57, %v1232_v57  ;;  %v1240_v59 = vrot.slane %v1232_v57, %v1231_v53 }
 0x4aa   :  { %v1247_v60 = vrot.slane %v1233_v58, %v1231_v53  ;;  %1251 = vst.msk [vmem:[%s1951_s9] sm:$0x1] %vm1250_vm6, %v1240_v59 }
 0x4ac   :  { %1252 = vst.msk [vmem:[%s1951_s9 + $0x1] sm:$0x1] %vm1250_vm6, %v1247_v60 }
 0x4ad   :  { %1588 = dma.done.wait [#allocation4], 128  }
 0x4ae   :  { %1589 = vsyncadd [#allocation4], 4294967168 }
 0x4af   :  { %1272 = vsyncpa [#allocation4], 1 }

</bundles_post_ra>
